<compile_context>
chip_gen: v7x
topology: tpu7x:2x2x1
jax: 0.10.0
libtpu: 0.0.40
codegen_flags: <defaults>
</compile_context>

<pallas_src>
import functools

import numpy as np
import jax
import jax.numpy as jnp
from jax import lax
from jax.experimental import pallas as pl
from jax.experimental.pallas import tpu as pltpu


def _leaky(x):
    return jnp.where(x >= 0.0, x, 0.2 * x)


def init_synthesis_kernel(w_ref, noise_ref, const_ref, vecs_ref, stylew_ref,
                          convw_ref, mask_ref, out_ref, *, H, W):
    N, C = const_ref.shape          # N = B * H * W
    HW = H * W
    B = N // HW

    # Packed per-channel parameter vectors.
    vecs = vecs_ref[...]                                     # (8, C)
    bias, nw1, nw2, convb = vecs[0:1], vecs[1:2], vecs[2:3], vecs[3:4]
    st1_sb, st1_bb, st2_sb, st2_bb = vecs[4:5], vecs[5:6], vecs[6:7], vecs[7:8]

    # All four AdaIN style projections in a single MXU matmul: (B,L)@(L,4C).
    styles = jnp.dot(w_ref[...], stylew_ref[...],
                     preferred_element_type=jnp.float32)     # (B, 4C)
    s1_scale = styles[:, 0 * C:1 * C] + st1_sb               # (B, C)
    s1_shift = styles[:, 1 * C:2 * C] + st1_bb
    s2_scale = styles[:, 2 * C:3 * C] + st2_sb
    s2_shift = styles[:, 3 * C:4 * C] + st2_bb

    noise = noise_ref[...]                                   # (N, 2) packed
    n1 = noise[:, 0:1]
    n2 = noise[:, 1:2]

    def adain(x, scale, shift):
        # InstanceNorm2d (biased variance, eps=1e-5) + learned style, per sample.
        outs = []
        for b in range(B):                                   # static unroll
            xb = x[b * HW:(b + 1) * HW, :]                   # (HW, C)
            mean = jnp.mean(xb, axis=0, keepdims=True)
            var = jnp.mean((xb - mean) ** 2, axis=0, keepdims=True)
            xn = (xb - mean) * lax.rsqrt(var + 1e-5)
            outs.append(xn * (1.0 + scale[b:b + 1, :]) + shift[b:b + 1, :])
        return jnp.concatenate(outs, axis=0) if B > 1 else outs[0]

    # init constant + bias, AddNoise 1, leaky_relu(0.2)
    x = _leaky(const_ref[...] + bias + n1 * nw1)             # (N, C)

    # AdaIN 1
    x = adain(x, s1_scale, s1_shift)

    # 3x3 conv, padding=1: roll-based im2col + one (N, 9C) @ (9C, C) matmul.
    masks = mask_ref[...]                                    # (N, 9) 0/1 taps
    parts = []
    for dy in range(3):
        for dx in range(3):
            k = dy * 3 + dx
            off = (dy - 1) * W + (dx - 1)
            shifted = x if off == 0 else pltpu.roll(x, shift=(-off) % N, axis=0)
            parts.append(shifted * masks[:, k:k + 1])
    cols = jnp.concatenate(parts, axis=1)                    # (N, 9C)
    x = jnp.dot(cols, convw_ref[...],
                preferred_element_type=jnp.float32) + convb  # (N, C)

    # AddNoise 2, leaky_relu(0.2)
    x = _leaky(x + n2 * nw2)

    # AdaIN 2
    out_ref[...] = adain(x, s2_scale, s2_shift)


def _boundary_masks(B, H, W):
    """masks[b*HW + i*W + j, dy*3+dx] = 1 iff (i+dy-1, j+dx-1) is inside the image."""
    HW = H * W
    m = np.zeros((HW, 9), np.float32)
    for dy in range(3):
        for dx in range(3):
            k = dy * 3 + dx
            for i in range(H):
                for j in range(W):
                    if 0 <= i + dy - 1 < H and 0 <= j + dx - 1 < W:
                        m[i * W + j, k] = 1.0
    return np.tile(m, (B, 1))


@functools.partial(jax.jit, static_argnums=(4, 5))
def init_synthesis_block(w, noise1, noise2, params, H, W):
    B, L = w.shape
    C = params["bias_init"].shape[0]
    HW = H * W
    N = B * HW

    # Kernel layout: rows = b*HW + i*W + j (sublanes), lanes = channels.
    const_flat = jnp.tile(params["init_const"].reshape(C, HW).T, (B, 1))   # (N, C)

    # Packed per-channel vectors: bias, nw1, nw2, conv_b, style biases.
    vecs = jnp.stack([
        params["bias_init"], params["nw1"], params["nw2"], params["conv_b"],
        params["st1_b"][:C], params["st1_b"][C:],
        params["st2_b"][:C], params["st2_b"][C:],
    ], axis=0)                                                             # (8, C)

    # Fused style weights (torch Linear: styles = w @ W.T + b):
    # lanes = [st1 scale | st1 shift | st2 scale | st2 shift].
    stylew = jnp.concatenate([
        params["st1_w"][:C].T, params["st1_w"][C:].T,
        params["st2_w"][:C].T, params["st2_w"][C:].T,
    ], axis=1)                                                             # (L, 4C)

    # im2col conv weight: row index (dy*3+dx)*C + ci, col = co.
    convw9 = jnp.transpose(params["conv_w"], (2, 3, 1, 0)).reshape(9 * C, C)

    noise = jnp.concatenate(
        [noise1.reshape(N, 1), noise2.reshape(N, 1)], axis=1)              # (N, 2)

    masks = jnp.asarray(_boundary_masks(B, H, W))                          # (N, 9)

    kernel = functools.partial(init_synthesis_kernel, H=H, W=W)
    out = pl.pallas_call(
        kernel,
        out_shape=jax.ShapeDtypeStruct((N, C), jnp.float32),
    )(w, noise, const_flat, vecs, stylew, convw9, masks)

    # (B*HW, C) -> NCHW (cheap XLA transpose + free reshape)
    return jnp.transpose(out.reshape(B, HW, C), (0, 2, 1)).reshape(B, C, H, W)


def reference(w, noise1, noise2, params):
    """Pure-JAX NCHW reference of the PyTorch forward."""
    B = w.shape[0]
    C = params["bias_init"].shape[0]

    def inorm(x):
        m = x.mean(axis=(2, 3), keepdims=True)
        v = ((x - m) ** 2).mean(axis=(2, 3), keepdims=True)
        return (x - m) / jnp.sqrt(v + 1e-5)

    def adain(x, sw, sb):
        st = w @ sw.T + sb
        s0 = st[:, :C].reshape(B, C, 1, 1)
        s1 = st[:, C:].reshape(B, C, 1, 1)
        return inorm(x) * (1.0 + s0) + s1

    x = params["init_const"] + params["bias_init"].reshape(1, C, 1, 1)
    x = jnp.broadcast_to(x, (B,) + x.shape[1:])
    x = x + params["nw1"].reshape(1, C, 1, 1) * noise1
    x = jnp.where(x >= 0, x, 0.2 * x)
    x = adain(x, params["st1_w"], params["st1_b"])
    x = lax.conv_general_dilated(x, params["conv_w"], (1, 1), "SAME",
                                 dimension_numbers=("NCHW", "OIHW", "NCHW"))
    x = x + params["conv_b"].reshape(1, C, 1, 1)
    x = x + params["nw2"].reshape(1, C, 1, 1) * noise2
    x = jnp.where(x >= 0, x, 0.2 * x)
    x = adain(x, params["st2_w"], params["st2_b"])
    return x


if __name__ == "__main__":
    B, L, C, S = 2, 32, 8, 4     # batch, latent_dim, channels, start_size
    key = jax.random.PRNGKey(0)
    ks = jax.random.split(key, 11)

    w = jax.random.normal(ks[0], (B, L), jnp.float32)
    noise1 = jax.random.normal(ks[1], (B, 1, S, S), jnp.float32)
    noise2 = jax.random.normal(ks[2], (B, 1, S, S), jnp.float32)

    # Deterministic synthetic parameters (shapes from __init__). AddNoise
    # weights are nonzero here so the noise path is actually exercised.
    params = dict(
        init_const=jnp.ones((1, C, S, S), jnp.float32),
        bias_init=jnp.ones((C,), jnp.float32),
        nw1=0.1 * jax.random.normal(ks[3], (C,), jnp.float32),
        nw2=0.1 * jax.random.normal(ks[4], (C,), jnp.float32),
        st1_w=0.1 * jax.random.normal(ks[5], (2 * C, L), jnp.float32),
        st1_b=0.1 * jax.random.normal(ks[6], (2 * C,), jnp.float32),
        st2_w=0.1 * jax.random.normal(ks[7], (2 * C, L), jnp.float32),
        st2_b=0.1 * jax.random.normal(ks[8], (2 * C,), jnp.float32),
        conv_w=0.1 * jax.random.normal(ks[9], (C, C, 3, 3), jnp.float32),
        conv_b=0.1 * jax.random.normal(ks[10], (C,), jnp.float32),
    )

    out = init_synthesis_block(w, noise1, noise2, params, S, S)
    out = jax.block_until_ready(out)
    assert out.shape == (B, C, S, S)

    ref = reference(w, noise1, noise2, params)
    np.testing.assert_allclose(np.asarray(out), np.asarray(ref), rtol=1e-4, atol=1e-4)
    print("KERNEL_OK")
</pallas_src>

<mosaic_0001>
module attributes {stable_mosaic.version = 11 : i64} {
  func.func @init_synthesis_kernel(%arg0: memref<2x32xf32, #tpu.memory_space<vmem>>, %arg1: memref<32x2xf32, #tpu.memory_space<vmem>>, %arg2: memref<32x8xf32, #tpu.memory_space<vmem>>, %arg3: memref<8x8xf32, #tpu.memory_space<vmem>>, %arg4: memref<32x32xf32, #tpu.memory_space<vmem>>, %arg5: memref<72x8xf32, #tpu.memory_space<vmem>>, %arg6: memref<32x9xf32, #tpu.memory_space<vmem>>, %arg7: memref<32x8xf32, #tpu.memory_space<vmem>>) attributes {dimension_semantics = [], scalar_prefetch = 0 : i64, scratch_operands = 0 : i64, tpu.core_type = #tpu.core_type<tc>} {
    %c0 = arith.constant 0 : index
    %c0_0 = arith.constant 0 : index
    %0 = vector.load %arg3[%c0, %c0_0] : memref<8x8xf32, #tpu.memory_space<vmem>>, vector<8x8xf32>
    %1 = vector.extract_strided_slice %0 {offsets = [0, 0], sizes = [1, 8], strides = [1, 1]} : vector<8x8xf32> to vector<1x8xf32>
    %2 = vector.extract_strided_slice %0 {offsets = [1, 0], sizes = [1, 8], strides = [1, 1]} : vector<8x8xf32> to vector<1x8xf32>
    %3 = vector.extract_strided_slice %0 {offsets = [2, 0], sizes = [1, 8], strides = [1, 1]} : vector<8x8xf32> to vector<1x8xf32>
    %4 = vector.extract_strided_slice %0 {offsets = [3, 0], sizes = [1, 8], strides = [1, 1]} : vector<8x8xf32> to vector<1x8xf32>
    %5 = vector.extract_strided_slice %0 {offsets = [4, 0], sizes = [1, 8], strides = [1, 1]} : vector<8x8xf32> to vector<1x8xf32>
    %6 = vector.extract_strided_slice %0 {offsets = [5, 0], sizes = [1, 8], strides = [1, 1]} : vector<8x8xf32> to vector<1x8xf32>
    %7 = vector.extract_strided_slice %0 {offsets = [6, 0], sizes = [1, 8], strides = [1, 1]} : vector<8x8xf32> to vector<1x8xf32>
    %8 = vector.extract_strided_slice %0 {offsets = [7, 0], sizes = [1, 8], strides = [1, 1]} : vector<8x8xf32> to vector<1x8xf32>
    %c0_1 = arith.constant 0 : index
    %c0_2 = arith.constant 0 : index
    %9 = vector.load %arg0[%c0_1, %c0_2] : memref<2x32xf32, #tpu.memory_space<vmem>>, vector<2x32xf32>
    %c0_3 = arith.constant 0 : index
    %c0_4 = arith.constant 0 : index
    %10 = vector.load %arg4[%c0_3, %c0_4] : memref<32x32xf32, #tpu.memory_space<vmem>>, vector<32x32xf32>
    %cst = arith.constant dense<0.000000e+00> : vector<2x32xf32>
    %11 = tpu.matmul %9, %10, %cst {dimension_numbers = #tpu.dot_dimension_numbers<[1], [0], [0], [1], [0, 0, 1, 1], [], []>} : vector<2x32xf32>, vector<32x32xf32>, vector<2x32xf32> -> vector<2x32xf32>
    %12 = vector.extract_strided_slice %11 {offsets = [0, 0], sizes = [2, 8], strides = [1, 1]} : vector<2x32xf32> to vector<2x8xf32>
    %13 = vector.broadcast %5 : vector<1x8xf32> to vector<2x8xf32>
    %14 = arith.addf %12, %13 : vector<2x8xf32>
    %15 = vector.extract_strided_slice %11 {offsets = [0, 8], sizes = [2, 8], strides = [1, 1]} : vector<2x32xf32> to vector<2x8xf32>
    %16 = vector.broadcast %6 : vector<1x8xf32> to vector<2x8xf32>
    %17 = arith.addf %15, %16 : vector<2x8xf32>
    %18 = vector.extract_strided_slice %11 {offsets = [0, 16], sizes = [2, 8], strides = [1, 1]} : vector<2x32xf32> to vector<2x8xf32>
    %19 = vector.broadcast %7 : vector<1x8xf32> to vector<2x8xf32>
    %20 = arith.addf %18, %19 : vector<2x8xf32>
    %21 = vector.extract_strided_slice %11 {offsets = [0, 24], sizes = [2, 8], strides = [1, 1]} : vector<2x32xf32> to vector<2x8xf32>
    %22 = vector.broadcast %8 : vector<1x8xf32> to vector<2x8xf32>
    %23 = arith.addf %21, %22 : vector<2x8xf32>
    %c0_5 = arith.constant 0 : index
    %c0_6 = arith.constant 0 : index
    %24 = vector.load %arg1[%c0_5, %c0_6] : memref<32x2xf32, #tpu.memory_space<vmem>>, vector<32x2xf32>
    %25 = vector.extract_strided_slice %24 {offsets = [0, 0], sizes = [32, 1], strides = [1, 1]} : vector<32x2xf32> to vector<32x1xf32>
    %26 = vector.extract_strided_slice %24 {offsets = [0, 1], sizes = [32, 1], strides = [1, 1]} : vector<32x2xf32> to vector<32x1xf32>
    %c0_7 = arith.constant 0 : index
    %c0_8 = arith.constant 0 : index
    %27 = vector.load %arg2[%c0_7, %c0_8] : memref<32x8xf32, #tpu.memory_space<vmem>>, vector<32x8xf32>
    %28 = vector.broadcast %1 : vector<1x8xf32> to vector<32x8xf32>
    %29 = arith.addf %27, %28 : vector<32x8xf32>
    %30 = vector.broadcast %25 : vector<32x1xf32> to vector<32x8xf32>
    %31 = vector.broadcast %2 : vector<1x8xf32> to vector<32x8xf32>
    %32 = arith.mulf %30, %31 : vector<32x8xf32>
    %33 = arith.addf %29, %32 : vector<32x8xf32>
    %cst_9 = arith.constant 0.000000e+00 : f32
    %34 = vector.broadcast %cst_9 : f32 to vector<32x8xf32>
    %35 = arith.cmpf oge, %33, %34 : vector<32x8xf32>
    %cst_10 = arith.constant 2.000000e-01 : f32
    %36 = vector.broadcast %cst_10 : f32 to vector<32x8xf32>
    %37 = arith.mulf %36, %33 : vector<32x8xf32>
    %38 = arith.select %35, %33, %37 : vector<32x8xi1>, vector<32x8xf32>
    %39 = vector.extract_strided_slice %38 {offsets = [0, 0], sizes = [16, 8], strides = [1, 1]} : vector<32x8xf32> to vector<16x8xf32>
    %cst_11 = arith.constant dense<0.000000e+00> : vector<8xf32>
    %40 = vector.multi_reduction <add>, %39, %cst_11 [0] : vector<16x8xf32> to vector<8xf32>
    %41 = vector.shape_cast %40 : vector<8xf32> to vector<1x8xf32>
    %cst_12 = arith.constant 1.600000e+01 : f32
    %42 = vector.broadcast %cst_12 : f32 to vector<1x8xf32>
    %43 = arith.divf %41, %42 : vector<1x8xf32>
    %44 = vector.broadcast %43 : vector<1x8xf32> to vector<16x8xf32>
    %45 = arith.subf %39, %44 : vector<16x8xf32>
    %46 = arith.mulf %45, %45 : vector<16x8xf32>
    %cst_13 = arith.constant dense<0.000000e+00> : vector<8xf32>
    %47 = vector.multi_reduction <add>, %46, %cst_13 [0] : vector<16x8xf32> to vector<8xf32>
    %48 = vector.shape_cast %47 : vector<8xf32> to vector<1x8xf32>
    %cst_14 = arith.constant 1.600000e+01 : f32
    %49 = vector.broadcast %cst_14 : f32 to vector<1x8xf32>
    %50 = arith.divf %48, %49 : vector<1x8xf32>
    %51 = vector.broadcast %43 : vector<1x8xf32> to vector<16x8xf32>
    %52 = arith.subf %39, %51 : vector<16x8xf32>
    %cst_15 = arith.constant 9.99999974E-6 : f32
    %53 = vector.broadcast %cst_15 : f32 to vector<1x8xf32>
    %54 = arith.addf %50, %53 : vector<1x8xf32>
    %55 = math.rsqrt %54 : vector<1x8xf32>
    %56 = vector.broadcast %55 : vector<1x8xf32> to vector<16x8xf32>
    %57 = arith.mulf %52, %56 : vector<16x8xf32>
    %58 = vector.extract_strided_slice %14 {offsets = [0, 0], sizes = [1, 8], strides = [1, 1]} : vector<2x8xf32> to vector<1x8xf32>
    %cst_16 = arith.constant 1.000000e+00 : f32
    %59 = vector.broadcast %cst_16 : f32 to vector<1x8xf32>
    %60 = arith.addf %59, %58 : vector<1x8xf32>
    %61 = vector.broadcast %60 : vector<1x8xf32> to vector<16x8xf32>
    %62 = arith.mulf %57, %61 : vector<16x8xf32>
    %63 = vector.extract_strided_slice %17 {offsets = [0, 0], sizes = [1, 8], strides = [1, 1]} : vector<2x8xf32> to vector<1x8xf32>
    %64 = vector.broadcast %63 : vector<1x8xf32> to vector<16x8xf32>
    %65 = arith.addf %62, %64 : vector<16x8xf32>
    %66 = vector.extract_strided_slice %38 {offsets = [16, 0], sizes = [16, 8], strides = [1, 1]} : vector<32x8xf32> to vector<16x8xf32>
    %cst_17 = arith.constant dense<0.000000e+00> : vector<8xf32>
    %67 = vector.multi_reduction <add>, %66, %cst_17 [0] : vector<16x8xf32> to vector<8xf32>
    %68 = vector.shape_cast %67 : vector<8xf32> to vector<1x8xf32>
    %cst_18 = arith.constant 1.600000e+01 : f32
    %69 = vector.broadcast %cst_18 : f32 to vector<1x8xf32>
    %70 = arith.divf %68, %69 : vector<1x8xf32>
    %71 = vector.broadcast %70 : vector<1x8xf32> to vector<16x8xf32>
    %72 = arith.subf %66, %71 : vector<16x8xf32>
    %73 = arith.mulf %72, %72 : vector<16x8xf32>
    %cst_19 = arith.constant dense<0.000000e+00> : vector<8xf32>
    %74 = vector.multi_reduction <add>, %73, %cst_19 [0] : vector<16x8xf32> to vector<8xf32>
    %75 = vector.shape_cast %74 : vector<8xf32> to vector<1x8xf32>
    %cst_20 = arith.constant 1.600000e+01 : f32
    %76 = vector.broadcast %cst_20 : f32 to vector<1x8xf32>
    %77 = arith.divf %75, %76 : vector<1x8xf32>
    %78 = vector.broadcast %70 : vector<1x8xf32> to vector<16x8xf32>
    %79 = arith.subf %66, %78 : vector<16x8xf32>
    %cst_21 = arith.constant 9.99999974E-6 : f32
    %80 = vector.broadcast %cst_21 : f32 to vector<1x8xf32>
    %81 = arith.addf %77, %80 : vector<1x8xf32>
    %82 = math.rsqrt %81 : vector<1x8xf32>
    %83 = vector.broadcast %82 : vector<1x8xf32> to vector<16x8xf32>
    %84 = arith.mulf %79, %83 : vector<16x8xf32>
    %85 = vector.extract_strided_slice %14 {offsets = [1, 0], sizes = [1, 8], strides = [1, 1]} : vector<2x8xf32> to vector<1x8xf32>
    %cst_22 = arith.constant 1.000000e+00 : f32
    %86 = vector.broadcast %cst_22 : f32 to vector<1x8xf32>
    %87 = arith.addf %86, %85 : vector<1x8xf32>
    %88 = vector.broadcast %87 : vector<1x8xf32> to vector<16x8xf32>
    %89 = arith.mulf %84, %88 : vector<16x8xf32>
    %90 = vector.extract_strided_slice %17 {offsets = [1, 0], sizes = [1, 8], strides = [1, 1]} : vector<2x8xf32> to vector<1x8xf32>
    %91 = vector.broadcast %90 : vector<1x8xf32> to vector<16x8xf32>
    %92 = arith.addf %89, %91 : vector<16x8xf32>
    %93 = tpu.concatenate %65, %92 in 0 : vector<16x8xf32>, vector<16x8xf32> -> vector<32x8xf32>
    %c0_23 = arith.constant 0 : index
    %c0_24 = arith.constant 0 : index
    %94 = vector.load %arg6[%c0_23, %c0_24] : memref<32x9xf32, #tpu.memory_space<vmem>>, vector<32x9xf32>
    %c5_i32 = arith.constant 5 : i32
    %95 = tpu.dynamic_rotate %93 by %c5_i32 dim 0 : vector<32x8xf32>, i32 -> vector<32x8xf32>
    %96 = vector.extract_strided_slice %94 {offsets = [0, 0], sizes = [32, 1], strides = [1, 1]} : vector<32x9xf32> to vector<32x1xf32>
    %97 = vector.broadcast %96 : vector<32x1xf32> to vector<32x8xf32>
    %98 = arith.mulf %95, %97 : vector<32x8xf32>
    %c4_i32 = arith.constant 4 : i32
    %99 = tpu.dynamic_rotate %93 by %c4_i32 dim 0 : vector<32x8xf32>, i32 -> vector<32x8xf32>
    %100 = vector.extract_strided_slice %94 {offsets = [0, 1], sizes = [32, 1], strides = [1, 1]} : vector<32x9xf32> to vector<32x1xf32>
    %101 = vector.broadcast %100 : vector<32x1xf32> to vector<32x8xf32>
    %102 = arith.mulf %99, %101 : vector<32x8xf32>
    %c3_i32 = arith.constant 3 : i32
    %103 = tpu.dynamic_rotate %93 by %c3_i32 dim 0 : vector<32x8xf32>, i32 -> vector<32x8xf32>
    %104 = vector.extract_strided_slice %94 {offsets = [0, 2], sizes = [32, 1], strides = [1, 1]} : vector<32x9xf32> to vector<32x1xf32>
    %105 = vector.broadcast %104 : vector<32x1xf32> to vector<32x8xf32>
    %106 = arith.mulf %103, %105 : vector<32x8xf32>
    %c1_i32 = arith.constant 1 : i32
    %107 = tpu.dynamic_rotate %93 by %c1_i32 dim 0 : vector<32x8xf32>, i32 -> vector<32x8xf32>
    %108 = vector.extract_strided_slice %94 {offsets = [0, 3], sizes = [32, 1], strides = [1, 1]} : vector<32x9xf32> to vector<32x1xf32>
    %109 = vector.broadcast %108 : vector<32x1xf32> to vector<32x8xf32>
    %110 = arith.mulf %107, %109 : vector<32x8xf32>
    %111 = vector.extract_strided_slice %94 {offsets = [0, 4], sizes = [32, 1], strides = [1, 1]} : vector<32x9xf32> to vector<32x1xf32>
    %112 = vector.broadcast %111 : vector<32x1xf32> to vector<32x8xf32>
    %113 = arith.mulf %93, %112 : vector<32x8xf32>
    %c31_i32 = arith.constant 31 : i32
    %114 = tpu.dynamic_rotate %93 by %c31_i32 dim 0 : vector<32x8xf32>, i32 -> vector<32x8xf32>
    %115 = vector.extract_strided_slice %94 {offsets = [0, 5], sizes = [32, 1], strides = [1, 1]} : vector<32x9xf32> to vector<32x1xf32>
    %116 = vector.broadcast %115 : vector<32x1xf32> to vector<32x8xf32>
    %117 = arith.mulf %114, %116 : vector<32x8xf32>
    %c29_i32 = arith.constant 29 : i32
    %118 = tpu.dynamic_rotate %93 by %c29_i32 dim 0 : vector<32x8xf32>, i32 -> vector<32x8xf32>
    %119 = vector.extract_strided_slice %94 {offsets = [0, 6], sizes = [32, 1], strides = [1, 1]} : vector<32x9xf32> to vector<32x1xf32>
    %120 = vector.broadcast %119 : vector<32x1xf32> to vector<32x8xf32>
    %121 = arith.mulf %118, %120 : vector<32x8xf32>
    %c28_i32 = arith.constant 28 : i32
    %122 = tpu.dynamic_rotate %93 by %c28_i32 dim 0 : vector<32x8xf32>, i32 -> vector<32x8xf32>
    %123 = vector.extract_strided_slice %94 {offsets = [0, 7], sizes = [32, 1], strides = [1, 1]} : vector<32x9xf32> to vector<32x1xf32>
    %124 = vector.broadcast %123 : vector<32x1xf32> to vector<32x8xf32>
    %125 = arith.mulf %122, %124 : vector<32x8xf32>
    %c27_i32 = arith.constant 27 : i32
    %126 = tpu.dynamic_rotate %93 by %c27_i32 dim 0 : vector<32x8xf32>, i32 -> vector<32x8xf32>
    %127 = vector.extract_strided_slice %94 {offsets = [0, 8], sizes = [32, 1], strides = [1, 1]} : vector<32x9xf32> to vector<32x1xf32>
    %128 = vector.broadcast %127 : vector<32x1xf32> to vector<32x8xf32>
    %129 = arith.mulf %126, %128 : vector<32x8xf32>
    %130 = tpu.concatenate %98, %102, %106, %110, %113, %117, %121, %125, %129 in 1 : vector<32x8xf32>, vector<32x8xf32>, vector<32x8xf32>, vector<32x8xf32>, vector<32x8xf32>, vector<32x8xf32>, vector<32x8xf32>, vector<32x8xf32>, vector<32x8xf32> -> vector<32x72xf32>
    %c0_25 = arith.constant 0 : index
    %c0_26 = arith.constant 0 : index
    %131 = vector.load %arg5[%c0_25, %c0_26] : memref<72x8xf32, #tpu.memory_space<vmem>>, vector<72x8xf32>
    %cst_27 = arith.constant dense<0.000000e+00> : vector<32x8xf32>
    %132 = tpu.matmul %130, %131, %cst_27 {dimension_numbers = #tpu.dot_dimension_numbers<[1], [0], [0], [1], [0, 0, 1, 1], [], []>} : vector<32x72xf32>, vector<72x8xf32>, vector<32x8xf32> -> vector<32x8xf32>
    %133 = vector.broadcast %4 : vector<1x8xf32> to vector<32x8xf32>
    %134 = arith.addf %132, %133 : vector<32x8xf32>
    %135 = vector.broadcast %26 : vector<32x1xf32> to vector<32x8xf32>
    %136 = vector.broadcast %3 : vector<1x8xf32> to vector<32x8xf32>
    %137 = arith.mulf %135, %136 : vector<32x8xf32>
    %138 = arith.addf %134, %137 : vector<32x8xf32>
    %cst_28 = arith.constant 0.000000e+00 : f32
    %139 = vector.broadcast %cst_28 : f32 to vector<32x8xf32>
    %140 = arith.cmpf oge, %138, %139 : vector<32x8xf32>
    %cst_29 = arith.constant 2.000000e-01 : f32
    %141 = vector.broadcast %cst_29 : f32 to vector<32x8xf32>
    %142 = arith.mulf %141, %138 : vector<32x8xf32>
    %143 = arith.select %140, %138, %142 : vector<32x8xi1>, vector<32x8xf32>
    %144 = vector.extract_strided_slice %143 {offsets = [0, 0], sizes = [16, 8], strides = [1, 1]} : vector<32x8xf32> to vector<16x8xf32>
    %cst_30 = arith.constant dense<0.000000e+00> : vector<8xf32>
    %145 = vector.multi_reduction <add>, %144, %cst_30 [0] : vector<16x8xf32> to vector<8xf32>
    %146 = vector.shape_cast %145 : vector<8xf32> to vector<1x8xf32>
    %cst_31 = arith.constant 1.600000e+01 : f32
    %147 = vector.broadcast %cst_31 : f32 to vector<1x8xf32>
    %148 = arith.divf %146, %147 : vector<1x8xf32>
    %149 = vector.broadcast %148 : vector<1x8xf32> to vector<16x8xf32>
    %150 = arith.subf %144, %149 : vector<16x8xf32>
    %151 = arith.mulf %150, %150 : vector<16x8xf32>
    %cst_32 = arith.constant dense<0.000000e+00> : vector<8xf32>
    %152 = vector.multi_reduction <add>, %151, %cst_32 [0] : vector<16x8xf32> to vector<8xf32>
    %153 = vector.shape_cast %152 : vector<8xf32> to vector<1x8xf32>
    %cst_33 = arith.constant 1.600000e+01 : f32
    %154 = vector.broadcast %cst_33 : f32 to vector<1x8xf32>
    %155 = arith.divf %153, %154 : vector<1x8xf32>
    %156 = vector.broadcast %148 : vector<1x8xf32> to vector<16x8xf32>
    %157 = arith.subf %144, %156 : vector<16x8xf32>
    %cst_34 = arith.constant 9.99999974E-6 : f32
    %158 = vector.broadcast %cst_34 : f32 to vector<1x8xf32>
    %159 = arith.addf %155, %158 : vector<1x8xf32>
    %160 = math.rsqrt %159 : vector<1x8xf32>
    %161 = vector.broadcast %160 : vector<1x8xf32> to vector<16x8xf32>
    %162 = arith.mulf %157, %161 : vector<16x8xf32>
    %163 = vector.extract_strided_slice %20 {offsets = [0, 0], sizes = [1, 8], strides = [1, 1]} : vector<2x8xf32> to vector<1x8xf32>
    %cst_35 = arith.constant 1.000000e+00 : f32
    %164 = vector.broadcast %cst_35 : f32 to vector<1x8xf32>
    %165 = arith.addf %164, %163 : vector<1x8xf32>
    %166 = vector.broadcast %165 : vector<1x8xf32> to vector<16x8xf32>
    %167 = arith.mulf %162, %166 : vector<16x8xf32>
    %168 = vector.extract_strided_slice %23 {offsets = [0, 0], sizes = [1, 8], strides = [1, 1]} : vector<2x8xf32> to vector<1x8xf32>
    %169 = vector.broadcast %168 : vector<1x8xf32> to vector<16x8xf32>
    %170 = arith.addf %167, %169 : vector<16x8xf32>
    %171 = vector.extract_strided_slice %143 {offsets = [16, 0], sizes = [16, 8], strides = [1, 1]} : vector<32x8xf32> to vector<16x8xf32>
    %cst_36 = arith.constant dense<0.000000e+00> : vector<8xf32>
    %172 = vector.multi_reduction <add>, %171, %cst_36 [0] : vector<16x8xf32> to vector<8xf32>
    %173 = vector.shape_cast %172 : vector<8xf32> to vector<1x8xf32>
    %cst_37 = arith.constant 1.600000e+01 : f32
    %174 = vector.broadcast %cst_37 : f32 to vector<1x8xf32>
    %175 = arith.divf %173, %174 : vector<1x8xf32>
    %176 = vector.broadcast %175 : vector<1x8xf32> to vector<16x8xf32>
    %177 = arith.subf %171, %176 : vector<16x8xf32>
    %178 = arith.mulf %177, %177 : vector<16x8xf32>
    %cst_38 = arith.constant dense<0.000000e+00> : vector<8xf32>
    %179 = vector.multi_reduction <add>, %178, %cst_38 [0] : vector<16x8xf32> to vector<8xf32>
    %180 = vector.shape_cast %179 : vector<8xf32> to vector<1x8xf32>
    %cst_39 = arith.constant 1.600000e+01 : f32
    %181 = vector.broadcast %cst_39 : f32 to vector<1x8xf32>
    %182 = arith.divf %180, %181 : vector<1x8xf32>
    %183 = vector.broadcast %175 : vector<1x8xf32> to vector<16x8xf32>
    %184 = arith.subf %171, %183 : vector<16x8xf32>
    %cst_40 = arith.constant 9.99999974E-6 : f32
    %185 = vector.broadcast %cst_40 : f32 to vector<1x8xf32>
    %186 = arith.addf %182, %185 : vector<1x8xf32>
    %187 = math.rsqrt %186 : vector<1x8xf32>
    %188 = vector.broadcast %187 : vector<1x8xf32> to vector<16x8xf32>
    %189 = arith.mulf %184, %188 : vector<16x8xf32>
    %190 = vector.extract_strided_slice %20 {offsets = [1, 0], sizes = [1, 8], strides = [1, 1]} : vector<2x8xf32> to vector<1x8xf32>
    %cst_41 = arith.constant 1.000000e+00 : f32
    %191 = vector.broadcast %cst_41 : f32 to vector<1x8xf32>
    %192 = arith.addf %191, %190 : vector<1x8xf32>
    %193 = vector.broadcast %192 : vector<1x8xf32> to vector<16x8xf32>
    %194 = arith.mulf %189, %193 : vector<16x8xf32>
    %195 = vector.extract_strided_slice %23 {offsets = [1, 0], sizes = [1, 8], strides = [1, 1]} : vector<2x8xf32> to vector<1x8xf32>
    %196 = vector.broadcast %195 : vector<1x8xf32> to vector<16x8xf32>
    %197 = arith.addf %194, %196 : vector<16x8xf32>
    %198 = tpu.concatenate %170, %197 in 0 : vector<16x8xf32>, vector<16x8xf32> -> vector<32x8xf32>
    %c0_42 = arith.constant 0 : index
    %c0_43 = arith.constant 0 : index
    %199 = vector.load %arg7[%c0_42, %c0_43] : memref<32x8xf32, #tpu.memory_space<vmem>>, vector<32x8xf32>
    tpu.vector_store %arg7[%c0_42, %c0_43], %198 {strides = array<i32>} : memref<32x8xf32, #tpu.memory_space<vmem>>, vector<32x8xf32>,
    return
  }
}

</mosaic_0001>

<bundles_post_ra>
// kernel: init_synthesis_block.1
= control target key start
LH: loop header
LB: loop body
LE: loop exit
PB: predicated region body
PF: predicated region fallthrough
CT: control target
= control target key end

     0   :  { %v107_v3 = vlaneseq  ;;  %v1125_v4 = vmov 0.0|0.0   ;;  %vm1126_vm0 = vmmov 0   ;;  %v1127_v7 = vmov 0.0   ;;  %s1707_s0 = inlined_call_operand.vmem [shape: f32[2,32], index: 0, kind: input, shape index: {}]   ;;  %s1708_s1 = inlined_call_operand.vmem [shape: f32[32,2], index: 1, kind: input, shape index: {}]   ;;  %s1709_s2 = inlined_call_operand.vmem [shape: f32[32,8], index: 2, kind: input, shape index: {}]   ;;  %s1710_s3 = inlined_call_operand.vmem [shape: f32[8,8], index: 3, kind: input, shape index: {}]   ;;  %s1711_s4 = inlined_call_operand.vmem [shape: f32[32,32], index: 4, kind: input, shape index: {}]   ;;  %s1712_s5 = inlined_call_operand.vmem [shape: f32[72,8], index: 5, kind: input, shape index: {}]   ;;  %s1713_s6 = inlined_call_operand.vmem [shape: f32[32,9], index: 6, kind: input, shape index: {}]   ;;  %s1714_s7 = inlined_call_operand.hbm [shape: f32[32,8], index: 7, kind: output, shape index: {}]  }
   0x1   :  { %v29_v0 = vld [vmem:[%s1711_s4] sm:$0xff]  ;;  %v30_v1 = vld [vmem:[%s1711_s4 + $0x8] sm:$0xff]  ;;  %v31_v2 = vld [vmem:[%s1711_s4 + $0x10] sm:$0xff]  ;;  %1017 = vmatprep.subr.bf16.mxu0 %v1125_v4  ;;  %990 = vmatprep.mubr.msk.f32.mxu0 %vm1126_vm0, %v1127_v7  ;;  %v1128_v9 = vmov 0  }
   0x2   :  { %v1018_v5 = vpack.c.bf16 %v30_v1, %v29_v0  ;;  %v32_v6 = vld [vmem:[%s1711_s4 + $0x18] sm:$0xff]  ;;  %v1205_v8 = vld [vmem:[%s1708_s1] sm:$0xff]  ;;  %1064 = vset.pattern.permute.xlu0 %v1128_v9  ;;  %1065 = vset.pattern.permute.xlu1 %v1128_v9  ;;  %v1212_v10 = vld [vmem:[%s1708_s1 + $0x10] sm:$0xff]  ;;  %v1214_v11 = vshrl.u32 %v107_v3, 7 }
   0x3   :  { %v1021_v12 = vpack.c.bf16 %v32_v6, %v31_v2  ;;  %157 = vperm.xlu0 %1064, %v1205_v8   ;;  %v1220_v13 = vld [vmem:[%s1708_s1 + $0x8] sm:$0xff]  ;;  %167 = vperm.xlu1 %1065, %v1212_v10   ;;  %v1226_v14 = vld [vmem:[%s1710_s3] sm:$0xff]  ;;  %v1232_v16 = vld [vmem:[%s1708_s1 + $0x18] sm:$0xff] }
   0x4   :  { %1019 = vmatpush3.bf16.msra.mxu0 %v1018_v5  ;;  %v114_v15 = vsub.s32 5, %v1214_v11 }
   0x5   :  { %1020 = vmatprep.subr.bf16.mxu0 %v1125_v4 }
   0x6   :  { %12 = vsyncpa [#allocation3], 0  ;;  %v28_v17 = vld [vmem:[%s1707_s0] sm:$0x3]  ;;  %vm33_vm1 = vcmask 261120   ;;  %v115_v18 = vrot.slane %v1226_v14, %v114_v15  ;;  %s1129_s1 = smov 8  }
   0x7   :  { %162 = vperm.xlu0 %1064, %v1220_v13   ;;  %172 = vperm.xlu1 %1065, %v1232_v16   ;;  %v1244_v19 = vld [vmem:[%s1713_s6] sm:$0xff]  ;;  %v1130_v20 = vmov 1   ;;  %v1253_v21 = vld [vmem:[%s1713_s6 + $0x8] sm:$0xff]  ;;  %v1131_v22 = vmov 2   ;;  %v1260_v23 = vld [vmem:[%s1713_s6 + $0x10] sm:$0xff]  ;;  %v1132_v25 = vmov 3  }
   0x8   :  { %1022 = vmatpush3.bf16.msra.mxu0 %v1021_v12  ;;  %v1267_v24 = vld [vmem:[%s1713_s6 + $0x18] sm:$0xff]  ;;  %v1133_v26 = vmov 4   ;;  %v1134_v27 = vmov 5   ;;  %v1135_v28 = vmov 6   ;;  %v1136_v29 = vmov 7   ;;  %v143_v34 = vld [vmem:[%s1709_s2] sm:$0xff] }
   0x9   :  { %v1137_v30 = vmov 8   ;;  %v1294_v31 = vsub.s32 0, %v1214_v11  ;;  %v1297_v32 = vsub.s32 1, %v1214_v11  ;;  %v144_v38 = vld [vmem:[%s1709_s2 + $0x8] sm:$0xff]  ;;  %vm199_vm3 = vcmask 64512   ;;  %s1138_s10 = smov 120  }
   0xa   :  { %vm333_vm7 = vcmp.lt.s32.totalorder %v1214_v11, 4  ;;  %vm362_vm8 = vcmp.lt.s32.totalorder %v1214_v11, 3  ;;  %vm391_vm9 = vcmp.lt.s32.totalorder %v1214_v11, 1  ;;  %vm300_vm10 = vcmp.lt.s32.totalorder %v1214_v11, 5  ;;  %s1140_s11 = smov 16   ;;  %s1141_s12 = smov 24  }
   0xb   :  { %991 = vmatmul.mubr.msk.f32.vlgmr.msra.gmra.mrb[0].mxu0 %vm33_vm1, %v28_v17  ;;  %117 = vrot.lane.b32.xlu0 %v115_v18, %s1129_s1  ;;  %v150_v33 = vrot.slane %v1226_v14, %v1294_v31  ;;  %v178_v35 = vrot.slane %v1226_v14, %v1297_v32  ;;  %v109_v17 = vsub.s32 4, %v1214_v11  ;;  %vm440_vm11 = vcmp.lt.s32.totalorder %v1214_v11, 7  ;;  %s1142_s3 = smov 40   ;;  %s1143_s23 = smov 48  }
   0xc   :  { %1066 = vset.pattern.permute.xlu1 %v1130_v20  ;;  %1067 = vset.pattern.permute.xlu0 %v1130_v20  ;;  %s1145_s29 = smov 64   ;;  %vm657_vm12 = vcmask 130048   ;;  %vm662_vm13 = vcmask 195584   ;;  %vm671_vm14 = vcmask 326656   ;;  %vm676_vm15 = vcmask 392192   ;;  %s1146_s30 = smov 112  }
   0xd   :  { %339 = vperm.xlu1 %1066, %v1244_v19   ;;  %v151_v36 = vadd.f32 %v150_v33, %v143_v34  ;;  %v152_v41 = vadd.f32 %v150_v33, %v144_v38  ;;  %vm681_vm0 = vcmask 457728   ;;  %s1147_s8 = smov 104   ;;  %s1148_s9 = smov [#allocation2]  }
   0xf   :  { %343 = vperm.xlu0 %1067, %v1253_v21  }
  0x11   :  { %1068 = vset.pattern.permute.xlu1 %v1131_v22 }
  0x12   :  { %368 = vperm.xlu1 %1068, %v1244_v19  }
  0x13   :  { %347 = vperm.xlu0 %1067, %v1260_v23  }
  0x16   :  { %372 = vperm.xlu1 %1068, %v1253_v21  }
  0x17   :  { %351 = vperm.xlu0 %1067, %v1267_v24  }
  0x1a   :  { %1069 = vset.pattern.permute.xlu1 %v1132_v25 }
  0x1b   :  { %401 = vperm.xlu1 %1069, %v1253_v21   ;;  %1072 = vset.pattern.permute.xlu0 %v1132_v25 }
  0x1c   :  { %397 = vperm.xlu0 %1072, %v1244_v19  }
  0x1f   :  { %1070 = vset.pattern.permute.xlu1 %v1133_v26 }
  0x20   :  { %417 = vperm.xlu1 %1070, %v1244_v19   ;;  %405 = vperm.xlu0 %1072, %v1260_v23  }
  0x24   :  { %421 = vperm.xlu1 %1070, %v1253_v21   ;;  %409 = vperm.xlu0 %1072, %v1267_v24  }
  0x28   :  { %1071 = vset.pattern.permute.xlu1 %v1134_v27  ;;  %1078 = vset.pattern.permute.xlu0 %v1134_v27 }
  0x29   :  { %446 = vperm.xlu1 %1071, %v1244_v19   ;;  %450 = vperm.xlu0 %1078, %v1253_v21  }
  0x2d   :  { %1073 = vset.pattern.permute.xlu1 %v1131_v22  ;;  %454 = vperm.xlu0 %1078, %v1260_v23  }
  0x2e   :  { %376 = vperm.xlu1 %1073, %v1260_v23  }
  0x31   :  { %1084 = vset.pattern.permute.xlu0 %v1135_v28 }
  0x32   :  { %1074 = vset.pattern.permute.xlu1 %v1135_v28  ;;  %474 = vperm.xlu0 %1084, %v1260_v23  }
  0x33   :  { %466 = vperm.xlu1 %1074, %v1244_v19  }
  0x36   :  { %1085 = vset.pattern.permute.xlu0 %v1136_v29 }
  0x37   :  { %1075 = vset.pattern.permute.xlu1 %v1131_v22  ;;  %490 = vperm.xlu0 %1085, %v1253_v21   ;;  %v110_v22 = vrot.slane %v1226_v14, %v109_v17 }
  0x38   :  { %380 = vperm.xlu1 %1075, %v1267_v24  }
  0x3c   :  { %1076 = vset.pattern.permute.xlu1 %v1135_v28 }
  0x3d   :  { %470 = vperm.xlu1 %1076, %v1253_v21  }
  0x41   :  { %1077 = vset.pattern.permute.xlu1 %v1136_v29 }
  0x42   :  { %486 = vperm.xlu1 %1077, %v1244_v19  }
  0x46   :  { %1079 = vset.pattern.permute.xlu1 %v1133_v26 }
  0x47   :  { %425 = vperm.xlu1 %1079, %v1260_v23  }
  0x4b   :  { %1080 = vset.pattern.permute.xlu1 %v1137_v30 }
  0x4c   :  { %506 = vperm.xlu1 %1080, %v1244_v19  }
  0x50   :  { %1081 = vset.pattern.permute.xlu1 %v1133_v26 }
  0x51   :  { %429 = vperm.xlu1 %1081, %v1267_v24  }
  0x55   :  { %1082 = vset.pattern.permute.xlu1 %v1137_v30 }
  0x56   :  { %510 = vperm.xlu1 %1082, %v1253_v21  }
  0x5a   :  { %1083 = vset.pattern.permute.xlu1 %v1134_v27  ;;  %v145_v27 = vld [vmem:[%s1709_s2 + $0x10] sm:$0xff] }
  0x5b   :  { %458 = vperm.xlu1 %1083, %v1267_v24  }
  0x5f   :  { %1086 = vset.pattern.permute.xlu1 %v1135_v28  ;;  %v146_v28 = vld [vmem:[%s1709_s2 + $0x18] sm:$0xff]  ;;  %s1139_s2 = smov 32  }
  0x60   :  { %478 = vperm.xlu1 %1086, %v1267_v24  }
  0x64   :  { %1087 = vset.pattern.permute.xlu1 %v1136_v29 }
  0x65   :  { %494 = vperm.xlu1 %1087, %v1260_v23  }
  0x69   :  { %1088 = vset.pattern.permute.xlu1 %v1137_v30 }
  0x82   :  { %v158_v37 = vpop.permute.xlu0 %157  ;;  %v168_v18 = vpop.permute.xlu1 %167 }
  0x83   :  { %v179_v39 = vmul.f32 %v178_v35, %v158_v37 }
  0x85   :  { %v183_v40 = vadd.f32 %v179_v39, %v151_v36 }
  0x86   :  { %v163_v42 = vpop.permute.xlu0 %162  ;;  %v173_v29 = vpop.permute.xlu1 %172 }
  0x87   :  { %vm187_vm2 = vcmp.ge.f32.partialorder %v183_v40, 0.0  ;;  %v191_v43 = vmul.f32 0.2, %v183_v40  ;;  %v180_v44 = vmul.f32 %v178_v35, %v163_v42  ;;  %v181_v42 = vmul.f32 %v178_v35, %v168_v18 }
  0x89   :  { %v195_v45 = vsel %vm187_vm2, %v183_v40, %v191_v43  ;;  %v184_v46 = vadd.f32 %v180_v44, %v152_v41  ;;  %v153_v41 = vadd.f32 %v150_v33, %v145_v27  ;;  %v154_v43 = vadd.f32 %v150_v33, %v146_v28 }
  0x8a   :  { %v200_v48 = vsel %vm199_vm3, %v195_v45, 0.0  ;;  %v118_v25 = vpop.permute.xlu0 %117  ;;  %v182_v44 = vmul.f32 %v178_v35, %v173_v29  ;;  %vm686_vm2 = vcmask 523264  }
  0x8b   :  { %vm188_vm4 = vcmp.ge.f32.partialorder %v184_v46, 0.0  ;;  %v192_v47 = vmul.f32 0.2, %v184_v46 }
  0x8c   :  { %v1337_v33 = vpop.permute.xlu1 %339 }
  0x8d   :  { %v196_v49 = vsel %vm188_vm4, %v184_v46, %v192_v47  ;;  %vm704_vm4 = vcmask 588800  }
  0x8e   :  { %v201_v50 = vsel %vm199_vm3, %v196_v49, 0.0  ;;  %v344_v17 = vpop.permute.xlu0 %343 }
  0x8f   :  { %v202_v51 = vadd.f32 %v201_v50, %v200_v48  ;;  %v185_v50 = vadd.f32 %v181_v42, %v153_v41 }
  0x91   :  { %v203_v52 = vrot.slane %v202_v51, 4  ;;  %v193_v35 = vmul.f32 0.2, %v185_v50  ;;  %vm189_vm5 = vcmp.ge.f32.partialorder %v185_v50, 0.0 }
  0x93   :  { %v204_v53 = vadd.f32 %v203_v52, %v202_v51  ;;  %v186_v51 = vadd.f32 %v182_v44, %v154_v43 }
  0x95   :  { %v205_v54 = vrot.slane %v204_v53, 2  ;;  %v194_v52 = vmul.f32 0.2, %v186_v51  ;;  %vm190_vm6 = vcmp.ge.f32.partialorder %v186_v51, 0.0 }
  0x97   :  { %v206_v55 = vadd.f32 %v205_v54, %v204_v53  ;;  %v1342_v53 = vpop.permute.xlu1 %368  ;;  %v197_v54 = vsel %vm189_vm5, %v185_v50, %v193_v35 }
  0x99   :  { %v207_v56 = vrot.slane %v206_v55, 1 }
  0x9b   :  { %v208_v57 = vadd.f32 %v207_v56, %v206_v55  ;;  %v198_v55 = vsel %vm190_vm6, %v186_v51, %v194_v52  ;;  %v246_v56 = vsel %vm199_vm3, %v197_v54, 0.0 }
  0x9d   :  { %v210_v58 = vmul.f32 0.0625, %v208_v57  ;;  %v247_v57 = vsel %vm199_vm3, %v198_v55, 0.0 }
  0x9f   :  { %v211_v59 = vsub.f32 %v195_v45, %v210_v58  ;;  %v212_v60 = vsub.f32 %v196_v49, %v210_v58  ;;  %v1349_v58 = vpop.permute.xlu1 %372 }
  0xa1   :  { %v213_v61 = vmul.f32 %v211_v59, %v211_v59  ;;  %v214_v62 = vmul.f32 %v212_v60, %v212_v60 }
  0xa3   :  { %v215_v63 = vsel %vm199_vm3, %v213_v61, 0.0  ;;  %v216_v0 = vsel %vm199_vm3, %v214_v62, 0.0 }
  0xa4   :  { %v217_v1 = vadd.f32 %v216_v0, %v215_v63 }
  0xa6   :  { %v218_v2 = vrot.slane %v217_v1, 4 }
  0xa8   :  { %v219_v3 = vadd.f32 %v218_v2, %v217_v1 }
  0xaa   :  { %v220_v4 = vrot.slane %v219_v3, 2 }
  0xac   :  { %v221_v5 = vadd.f32 %v220_v4, %v219_v3 }
  0xae   :  { %v222_v6 = vrot.slane %v221_v5, 1 }
  0xb0   :  { %v223_v7 = vadd.f32 %v222_v6, %v221_v5 }
  0xb2   :  { %v224_v12 = vmul.f32 0.0625, %v223_v7 }
  0xb4   :  { %v225_v15 = vadd.f32 1e-05, %v224_v12 }
  0xb6   :  { %1093 = vrsqrt.f32 %v225_v15 }
  0xc0   :  { %v1094_v37 = vpop.eup %1093 }
  0xc1   :  { %v227_v45 = vmul.f32 %v1094_v37, %v211_v59  ;;  %v228_v46 = vmul.f32 %v1094_v37, %v212_v60  ;;  %v248_v59 = vadd.f32 %v247_v57, %v246_v56 }
  0xc3   :  { %v249_v60 = vrot.slane %v248_v59, 4 }
  0xde   :  { %v1315_v26 = vpop.f32.mrb[0].mxu0 }
  0xdf   :  { %v111_v30 = vadd.f32 %v110_v22, %v1315_v26  ;;  %v120_v34 = vadd.f32 %v118_v25, %v1315_v26  ;;  %v992_v36 = vpop.f32.mrb[1].mxu0  ;;  %v1370_v25 = vpop.permute.xlu0 %347 }
  0xe1   :  { %v1325_v38 = vadd.f32 1.0, %v111_v30  ;;  %v239_v39 = vrot.slane %v120_v34, %v1294_v31  ;;  %v283_v40 = vrot.slane %v120_v34, %v1297_v32 }
  0xe3   :  { %285 = vrot.lane.b32.xlu0 %v283_v40, %s1138_s10  ;;  %241 = vrot.lane.b32.xlu1 %v239_v39, %s1138_s10  ;;  %v233_v47 = vrot.slane %v1325_v38, %v1294_v31  ;;  %v1374_v30 = vpop.permute.xlu0 %351  ;;  %s948_s10 = sshll.u32 %s1148_s9, 4  ;;  %s949_s10 = int_to_ptr.vmem [resolvable:$true] %s948_s10 }
  0xe4   :  { %p1106_p1 = scmp.lt.s32.totalorder %s949_s10, %s949_s10 }
  0xe5   :  { %v1331_v48 = vmul.f32 %v233_v47, %v227_v45  ;;  %v1333_v49 = vmul.f32 %v233_v47, %v228_v46 }
  0xe7   :  { %498 = vperm.xlu0 %1085, %v1267_v24   ;;  %514 = vperm.xlu1 %1088, %v1260_v23   ;;  %v1376_v37 = vpop.permute.xlu0 %397 }
  0xeb   :  { %1089 = vset.pattern.permute.xlu0 %v1128_v9  ;;  %518 = vperm.xlu1 %1088, %v1267_v24   ;;  %v1380_v42 = vpop.permute.xlu0 %405 }
  0xec   :  { %307 = vperm.xlu0 %1089, %v1244_v19   ;;  %v1353_v19 = vpop.permute.xlu1 %401 }
  0xef   :  { %1090 = vset.pattern.permute.xlu1 %v1128_v9  ;;  %v250_v9 = vadd.f32 %v249_v60, %v248_v59  ;;  %v1382_v45 = vpop.permute.xlu0 %409 }
  0xf0   :  { %322 = vperm.xlu0 %1089, %v1267_v24   ;;  %312 = vperm.xlu1 %1090, %v1253_v21   ;;  %v418_v24 = vpop.permute.xlu1 %417 }
  0xf1   :  { %v251_v61 = vrot.slane %v250_v9, 2 }
  0xf3   :  { %v252_v62 = vadd.f32 %v251_v61, %v250_v9  ;;  %v1386_v50 = vpop.permute.xlu0 %450  ;;  %v277_v61 = vrot.slane %v1325_v38, %v1297_v32 }
  0xf4   :  { %317 = vperm.xlu1 %1090, %v1260_v23   ;;  %1092 = vset.pattern.permute.xlu0 %v1130_v20  ;;  %v1356_v21 = vpop.permute.xlu1 %421 }
  0xf5   :  { %v253_v0 = vrot.slane %v252_v62, 1 }
  0xf7   :  { %v254_v1 = vadd.f32 %v253_v0, %v252_v62  ;;  %v1390_v52 = vpop.permute.xlu0 %454 }
  0xf8   :  { %1091 = vset.pattern.permute.xlu1 %v1130_v20  ;;  %v1358_v63 = vpop.permute.xlu1 %446 }
  0xf9   :  { %v255_v23 = vmul.f32 0.0625, %v254_v1 }
  0xfb   :  { %v256_v4 = vsub.f32 %v197_v54, %v255_v23  ;;  %v257_v5 = vsub.f32 %v198_v55, %v255_v23  ;;  %v1394_v55 = vpop.permute.xlu0 %474 }
  0xfc   :  { %v1360_v2 = vpop.permute.xlu1 %376 }
  0xfd   :  { %v258_v6 = vmul.f32 %v256_v4, %v256_v4  ;;  %v259_v7 = vmul.f32 %v257_v5, %v257_v5 }
  0xff   :  { %v260_v12 = vsel %vm199_vm3, %v258_v6, 0.0  ;;  %v261_v15 = vsel %vm199_vm3, %v259_v7, 0.0  ;;  %v1398_v59 = vpop.permute.xlu0 %490 }
 0x100   :  { %v1362_v3 = vpop.permute.xlu1 %466  ;;  %v262_v22 = vadd.f32 %v261_v15, %v260_v12 }
 0x102   :  { %v263_v27 = vrot.slane %v262_v22, 4 }
 0x104   :  { %v1364_v20 = vpop.permute.xlu1 %380  ;;  %v264_v29 = vadd.f32 %v263_v27, %v262_v22 }
 0x106   :  { %v265_v36 = vrot.slane %v264_v29, 2 }
 0x108   :  { %v1368_v18 = vpop.permute.xlu1 %470  ;;  %v266_v39 = vadd.f32 %v265_v36, %v264_v29 }
 0x10a   :  { %v267_v41 = vrot.slane %v266_v39, 1 }
 0x10c   :  { %v1372_v28 = vpop.permute.xlu1 %486  ;;  %v268_v44 = vadd.f32 %v267_v41, %v266_v39 }
 0x10e   :  { %v269_v46 = vmul.f32 0.0625, %v268_v44 }
 0x110   :  { %v426_v34 = vpop.permute.xlu1 %425  ;;  %v270_v51 = vadd.f32 1e-05, %v269_v46 }
 0x112   :  { %1095 = vrsqrt.f32 %v270_v51 }
 0x114   :  { %v1378_v40 = vpop.permute.xlu1 %506 }
 0x118   :  { %v430_v43 = vpop.permute.xlu1 %429 }
 0x11c   :  { %v1384_v47 = vpop.permute.xlu1 %510  ;;  %v1096_v56 = vpop.eup %1095 }
 0x11d   :  { %v272_v60 = vmul.f32 %v1096_v56, %v256_v4  ;;  %v273_v9 = vmul.f32 %v1096_v56, %v257_v5 }
 0x11f   :  { %v278_v62 = vmul.f32 %v277_v61, %v272_v60  ;;  %v279_v0 = vmul.f32 %v277_v61, %v273_v9 }
 0x120   :  { %v1388_v35 = vpop.permute.xlu1 %458 }
 0x124   :  { %v1392_v54 = vpop.permute.xlu1 %478 }
 0x128   :  { %v1396_v57 = vpop.permute.xlu1 %494 }
 0x155   :  { %v242_v1 = vpop.permute.xlu1 %241  ;;  %v286_v23 = vpop.permute.xlu0 %285 }
 0x156   :  { %v1403_v6 = vadd.f32 %v242_v1, %v1331_v48  ;;  %v1406_v7 = vadd.f32 %v242_v1, %v1333_v49  ;;  %v1408_v12 = vadd.f32 %v286_v23, %v278_v62  ;;  %v1410_v15 = vadd.f32 %v286_v23, %v279_v0 }
 0x158   :  { %v434_v4 = vmul.f32 %v426_v34, %v1408_v12  ;;  %v432_v38 = vmul.f32 %v418_v24, %v1403_v6  ;;  %v329_v5 = vrot.slane %v1403_v6, 4  ;;  %v330_v48 = vrot.slane %v1406_v7, 4 }
 0x159   :  { %v358_v22 = vrot.slane %v1403_v6, 5  ;;  %v359_v49 = vrot.slane %v1406_v7, 5  ;;  %v361_v27 = vrot.slane %v1410_v15, 5  ;;  %v332_v29 = vrot.slane %v1410_v15, 4 }
 0x15a   :  { %581 = vrot.lane.b32.xlu0 %v434_v4, %s1139_s2  ;;  %577 = vrot.lane.b32.xlu1 %v432_v38, %s1139_s2  ;;  %v387_v24 = vrot.slane %v1403_v6, 7  ;;  %v1428_v34 = vsel %vm333_vm7, %v329_v5, %v330_v48  ;;  %v388_v39 = vrot.slane %v1406_v7, 7  ;;  %v331_v41 = vrot.slane %v1408_v12, 4 }
 0x15b   :  { %v365_v36 = vsel %vm362_vm8, %v358_v22, %v359_v49  ;;  %v433_v44 = vmul.f32 %v1356_v21, %v1406_v7  ;;  %v355_v46 = vmul.f32 %v344_v17, %v1428_v34  ;;  %v1439_v51 = vsel %vm333_vm7, %v332_v29, %v329_v5 }
 0x15c   :  { %v360_v56 = vrot.slane %v1408_v12, 5  ;;  %v394_v60 = vsel %vm391_vm9, %v387_v24, %v388_v39  ;;  %v1448_v9 = vsel %vm362_vm8, %v361_v27, %v358_v22  ;;  %v1454_v21 = vsel %vm333_vm7, %v330_v48, %v331_v41 }
 0x15d   :  { %v294_v17 = vrot.slane %v1403_v6, 3  ;;  %v435_v61 = vmul.f32 %v430_v43, %v1410_v15  ;;  %v297_v62 = vrot.slane %v1410_v15, 3  ;;  %v390_v0 = vrot.slane %v1410_v15, 7 }
 0x15e   :  { %579 = vrot.lane.b32.xlu1 %v433_v44, %s1139_s2  ;;  %531 = vrot.lane.b32.xlu0 %v355_v46, %s1129_s1  ;;  %v436_v1 = vrot.slane %v1403_v6, 1  ;;  %v384_v23 = vmul.f32 %v1349_v58, %v365_v36  ;;  %v437_v4 = vrot.slane %v1406_v7, 1  ;;  %v295_v38 = vrot.slane %v1406_v7, 3 }
 0x15f   :  { %v296_v5 = vrot.slane %v1408_v12, 3  ;;  %v1471_v48 = vsel %vm300_vm10, %v297_v62, %v294_v17  ;;  %v395_v43 = vsel %vm391_vm9, %v390_v0, %v387_v24  ;;  %v364_v58 = vsel %vm362_vm8, %v359_v49, %v360_v56 }
 0x160   :  { %v443_v6 = vsel %vm440_vm11, %v436_v1, %v437_v4  ;;  %v438_v7 = vrot.slane %v1408_v12, 1  ;;  %v1488_v22 = vsel %vm300_vm10, %v294_v17, %v295_v38  ;;  %v354_v24 = vmul.f32 %v1337_v33, %v1439_v51 }
 0x161   :  { %v413_v44 = vmul.f32 %v1353_v19, %v394_v60  ;;  %v1497_v49 = vsel %vm300_vm10, %v295_v38, %v296_v5  ;;  %v521_v33 = vmul.f32 %v1378_v40, %v365_v36  ;;  %v439_v19 = vrot.slane %v1410_v15, 1  ;;  %v691_v40 = vld [vmem:[%s1712_s5] sm:$0xff] }
 0x162   :  { %583 = vrot.lane.b32.xlu1 %v435_v61, %s1139_s2  ;;  %547 = vrot.lane.b32.xlu0 %v384_v23, %s1140_s11  ;;  %v442_v46 = vsel %vm440_vm11, %v437_v4, %v438_v7  ;;  %v389_v61 = vrot.slane %v1408_v12, 7  ;;  %v1509_v60 = vmul.f32 %v1384_v47, %v364_v58  ;;  %v383_v23 = vmul.f32 %v1342_v53, %v1448_v9  ;;  %v692_v47 = vld [vmem:[%s1712_s5 + $0x8] sm:$0xff]  ;;  %s1101_s2 = scalar_lea.vmem %s949_s10, 512 }
 0x163   :  { %v356_v4 = vmul.f32 %v1370_v25, %v1454_v21  ;;  %v444_v38 = vsel %vm440_vm11, %v439_v19, %v436_v1  ;;  %v1023_v36 = vpack.c.bf16 %v692_v47, %v691_v40  ;;  %v412_v53 = vmul.f32 %v1376_v37, %v395_v43  ;;  %v693_v1 = vld [vmem:[%s1712_s5 + $0x10] sm:$0xff]  ;;  %v696_v43 = vld [vmem:[%s1712_s5 + $0x28] sm:$0xff]  ;;  %p1102_p0 = scmp.ne.s32.totalorder %s949_s10, %s1101_s2  ;;  %p1107_p2 = scmp.lt.s32.totalorder %s1101_s2, %s1101_s2 }
 0x164   :  { %v393_v17 = vsel %vm391_vm9, %v388_v39, %v389_v61  ;;  %v461_v25 = vmul.f32 %v1358_v63, %v443_v6  ;;  %v1531_v39 = vsel %vm333_vm7, %v331_v41, %v332_v29  ;;  %v385_v29 = vmul.f32 %v1360_v2, %v364_v58  ;;  %v695_v41 = vld [vmem:[%s1712_s5 + $0x20] sm:$0xff] }
 0x165   :  { %1024 = vmatprep.subr.bf16.mxu1 %v1023_v36  ;;  %v357_v37 = vmul.f32 %v1374_v30, %v1531_v39  ;;  %v1031_v6 = vpack.c.bf16 %v696_v43, %v695_v41  ;;  %v481_v30 = vmul.f32 %v1362_v3, %v1488_v22  ;;  %v462_v2 = vmul.f32 %v1386_v50, %v442_v46  ;;  %v697_v3 = vld [vmem:[%s1712_s5 + $0x30] sm:$0xff]  ;;  %v698_v50 = vld [vmem:[%s1712_s5 + $0x38] sm:$0xff]  ;;  %p1108_p3 = por %p1107_p2, %p1106_p1 }
 0x166   :  { %529 = vrot.lane.b32.xlu1 %v354_v24, %s1129_s1  ;;  %563 = vrot.lane.b32.xlu0 %v413_v44, %s1141_s12  ;;  %v694_v24 = vld [vmem:[%s1712_s5 + $0x18] sm:$0xff]  ;;  %v363_v58 = vsel %vm362_vm8, %v360_v56, %v361_v27  ;;  %v1035_v44 = vpack.c.bf16 %v698_v50, %v697_v3  ;;  %v699_v27 = vld [vmem:[%s1712_s5 + $0x40] sm:$0xff]  ;;  %v482_v56 = vmul.f32 %v1368_v18, %v1497_v49  ;;  %s1144_s5 = smov 56  }
 0x167   :  { %1026 = vmatpush3.bf16.msra.mxu1 %v1023_v36  ;;  %v1027_v63 = vpack.c.bf16 %v694_v24, %v693_v1  ;;  %v386_v46 = vmul.f32 %v1364_v20, %v363_v58  ;;  %v392_v20 = vsel %vm391_vm9, %v389_v61, %v390_v0  ;;  %v441_v18 = vsel %vm440_vm11, %v438_v7, %v439_v19  ;;  %p1109_p4 = pnand %p1108_p3, %p1102_p0 }
 0x168   :  { %v464_v0 = vmul.f32 %v1388_v35, %v444_v38  ;;  %v499_v35 = vpop.permute.xlu0 %498  ;;  %v503_v15 = vmul.f32 %v1396_v57, %v1531_v39  ;;  %v132_v57 = vsub.s32 7, %v1214_v11 }
 0x169   :  { %1028 = vmatprep.subr.bf16.mxu1 %v1027_v63  ;;  %v504_v12 = vmul.f32 %v499_v35, %v1439_v51 }
 0x16a   :  { %545 = vrot.lane.b32.xlu1 %v383_v23, %s1140_s11  ;;  %533 = vrot.lane.b32.xlu0 %v356_v4, %s1129_s1  ;;  %v414_v23 = vmul.f32 %v1380_v42, %v393_v17  ;;  %v501_v4 = vmul.f32 %v1372_v28, %v1428_v34  ;;  %v415_v42 = vmul.f32 %v1382_v45, %v392_v20 }
 0x16b   :  { %1030 = vmatpush3.bf16.msra.mxu1 %v1027_v63  ;;  %v502_v28 = vmul.f32 %v1398_v59, %v1454_v21  ;;  %v463_v34 = vmul.f32 %v1390_v52, %v441_v18  ;;  %v1602_v45 = vsel %vm300_vm10, %v296_v5, %v297_v62  ;;  %v515_v59 = vpop.permute.xlu1 %514  ;;  %v484_v52 = vmul.f32 %v1392_v54, %v1471_v48 }
 0x16c   :  { %1032 = vmatprep.subr.bf16.mxu1 %v1031_v6  ;;  %v483_v21 = vmul.f32 %v1394_v55, %v1602_v45  ;;  %v523_v5 = vmul.f32 %v515_v59, %v363_v58  ;;  %v123_v54 = vsub.s32 6, %v1214_v11  ;;  %v133_v51 = vrot.slane %v1226_v14, %v132_v57 }
 0x16e   :  { %561 = vrot.lane.b32.xlu1 %v412_v53, %s1141_s12  ;;  %593 = vrot.lane.b32.xlu0 %v461_v25, %s1142_s3  ;;  %v124_v55 = vrot.slane %v1226_v14, %v123_v54 }
 0x16f   :  { %1034 = vmatpush3.bf16.msra.mxu1 %v1031_v6  ;;  %v519_v62 = vpop.permute.xlu1 %518 }
 0x170   :  { %1036 = vmatprep.subr.bf16.mxu1 %v1035_v44  ;;  %v524_v7 = vmul.f32 %v519_v62, %v1448_v9  ;;  %v308_v9 = vpop.permute.xlu0 %307 }
 0x171   :  { %v325_v24 = vmul.f32 %v308_v9, %v1471_v48 }
 0x172   :  { %535 = vrot.lane.b32.xlu1 %v357_v37, %s1129_s1  ;;  %549 = vrot.lane.b32.xlu0 %v385_v29, %s1140_s11 }
 0x173   :  { %1038 = vmatpush3.bf16.msra.mxu1 %v1035_v44  ;;  %v313_v61 = vpop.permute.xlu1 %312 }
 0x174   :  { %1009 = vmatprep.subr.mxu1 %v699_v27  ;;  %v326_v48 = vmul.f32 %v313_v61, %v1488_v22 }
 0x176   :  { %595 = vrot.lane.b32.xlu1 %v462_v2, %s1142_s3  ;;  %609 = vrot.lane.b32.xlu0 %v481_v30, %s1143_s23 }
 0x177   :  { %1010 = vmatpush3.msra.mxu1 %v699_v27 }
 0x17a   :  { %551 = vrot.lane.b32.xlu1 %v386_v46, %s1140_s11  ;;  %565 = vrot.lane.b32.xlu0 %v414_v23, %s1141_s12 }
 0x17e   :  { %611 = vrot.lane.b32.xlu1 %v482_v56, %s1143_s23  ;;  %625 = vrot.lane.b32.xlu0 %v501_v4, %s1144_s5 }
 0x182   :  { %567 = vrot.lane.b32.xlu1 %v415_v42, %s1141_s12  ;;  %641 = vrot.lane.b32.xlu0 %v521_v33, %s1145_s29  ;;  %v323_v33 = vpop.permute.xlu0 %322 }
 0x186   :  { %627 = vrot.lane.b32.xlu1 %v502_v28, %s1144_s5  ;;  %597 = vrot.lane.b32.xlu0 %v463_v34, %s1142_s3 }
 0x18a   :  { %643 = vrot.lane.b32.xlu1 %v1509_v60, %s1145_s29  ;;  %599 = vrot.lane.b32.xlu0 %v464_v0, %s1142_s3 }
 0x18e   :  { %613 = vrot.lane.b32.xlu1 %v483_v21, %s1143_s23  ;;  %615 = vrot.lane.b32.xlu0 %v484_v52, %s1143_s23 }
 0x192   :  { %629 = vrot.lane.b32.xlu1 %v503_v15, %s1144_s5  ;;  %631 = vrot.lane.b32.xlu0 %v504_v12, %s1144_s5  ;;  %v328_v12 = vmul.f32 %v323_v33, %v1602_v45 }
 0x196   :  { %645 = vrot.lane.b32.xlu1 %v523_v5, %s1145_s29  ;;  %647 = vrot.lane.b32.xlu0 %v524_v7, %s1145_s29 }
 0x19a   :  { %803 = vperm.xlu1 %1091, %v1205_v8   ;;  %807 = vperm.xlu0 %1092, %v1220_v13   ;;  %v318_v8 = vpop.permute.xlu1 %317 }
 0x19b   :  { %v327_v15 = vmul.f32 %v318_v8, %v1497_v49 }
 0x19e   :  { %811 = vperm.xlu1 %1091, %v1212_v10   ;;  %126 = vrot.lane.b32.xlu0 %v124_v55, %s1140_s11 }
 0x1a2   :  { %815 = vperm.xlu1 %1091, %v1232_v16  }
 0x1a6   :  { %135 = vrot.lane.b32.xlu1 %v133_v51, %s1141_s12 }
 0x1cc   :  { %v1626_v19 = vpop.permute.xlu0 %581  ;;  %v578_v13 = vpop.permute.xlu1 %577 }
 0x1d0   :  { %v580_v60 = vpop.permute.xlu1 %579  ;;  %v532_v17 = vpop.permute.xlu0 %531 }
 0x1d1   :  { %v654_v46 = vsel %vm199_vm3, %v326_v48, %v532_v17 }
 0x1d4   :  { %v1628_v10 = vpop.permute.xlu1 %583  ;;  %v548_v38 = vpop.permute.xlu0 %547 }
 0x1d5   :  { %v659_v4 = vsel %vm657_vm12, %v654_v46, %v548_v38 }
 0x1d8   :  { %v530_v40 = vpop.permute.xlu1 %529  ;;  %v564_v47 = vpop.permute.xlu0 %563 }
 0x1d9   :  { %v653_v29 = vsel %vm199_vm3, %v325_v24, %v530_v40  ;;  %v664_v42 = vsel %vm662_vm13, %v659_v4, %v564_v47 }
 0x1da   :  { %v668_v28 = vsel %vm33_vm1, %v664_v42, %v580_v60 }
 0x1dc   :  { %v546_v36 = vpop.permute.xlu1 %545  ;;  %v534_v16 = vpop.permute.xlu0 %533 }
 0x1dd   :  { %v658_v41 = vsel %vm657_vm12, %v653_v29, %v546_v36  ;;  %v655_v62 = vsel %vm199_vm3, %v327_v15, %v534_v16 }
 0x1e0   :  { %v562_v53 = vpop.permute.xlu1 %561  ;;  %v594_v25 = vpop.permute.xlu0 %593 }
 0x1e1   :  { %v663_v43 = vsel %vm662_vm13, %v658_v41, %v562_v53 }
 0x1e2   :  { %v667_v2 = vsel %vm33_vm1, %v663_v43, %v578_v13 }
 0x1e3   :  { %v672_v50 = vsel %vm671_vm14, %v667_v2, %v594_v25  ;;  %v702_v2 = vsub.s32 3, %v1214_v11 }
 0x1e4   :  { %v536_v39 = vpop.permute.xlu1 %535  ;;  %v550_v1 = vpop.permute.xlu0 %549 }
 0x1e5   :  { %v656_v5 = vsel %vm199_vm3, %v328_v12, %v536_v39  ;;  %v660_v55 = vsel %vm657_vm12, %v655_v62, %v550_v1 }
 0x1e8   :  { %v596_v63 = vpop.permute.xlu1 %595  ;;  %v610_v37 = vpop.permute.xlu0 %609 }
 0x1e9   :  { %v677_v44 = vsel %vm676_vm15, %v672_v50, %v610_v37  ;;  %v673_v34 = vsel %vm671_vm14, %v668_v28, %v596_v63 }
 0x1ec   :  { %v552_v6 = vpop.permute.xlu1 %551  ;;  %v566_v30 = vpop.permute.xlu0 %565 }
 0x1ed   :  { %v661_v57 = vsel %vm657_vm12, %v656_v5, %v552_v6  ;;  %v665_v51 = vsel %vm662_vm13, %v660_v55, %v566_v30 }
 0x1ee   :  { %v669_v49 = vsel %vm33_vm1, %v665_v51, %v1626_v19 }
 0x1f0   :  { %v612_v58 = vpop.permute.xlu1 %611  ;;  %v626_v3 = vpop.permute.xlu0 %625 }
 0x1f1   :  { %v682_v23 = vsel %vm681_vm0, %v677_v44, %v626_v3  ;;  %v678_v0 = vsel %vm676_vm15, %v673_v34, %v612_v58  ;;  %v820_v58 = vsub.s32 2, %v1214_v11  ;;  %v703_v3 = vrot.slane %v1226_v14, %v702_v2 }
 0x1f3   :  { %v821_v48 = vrot.slane %v1226_v14, %v820_v58 }
 0x1f4   :  { %v568_v27 = vpop.permute.xlu1 %567  ;;  %v642_v56 = vpop.permute.xlu0 %641 }
 0x1f5   :  { %v687_v20 = vsel %vm686_vm2, %v682_v23, %v642_v56  ;;  %v666_v9 = vsel %vm662_vm13, %v661_v57, %v568_v27 }
 0x1f6   :  { %1011 = vmatprep.mubr.msk.f32.mxu1 %vm704_vm4, %v687_v20  ;;  %v670_v33 = vsel %vm33_vm1, %v666_v9, %v1628_v10 }
 0x1f8   :  { %v628_v22 = vpop.permute.xlu1 %627  ;;  %v598_v18 = vpop.permute.xlu0 %597 }
 0x1f9   :  { %v683_v59 = vsel %vm681_vm0, %v678_v0, %v628_v22  ;;  %v674_v8 = vsel %vm671_vm14, %v669_v49, %v598_v18 }
 0x1fc   :  { %v644_v52 = vpop.permute.xlu1 %643  ;;  %v600_v21 = vpop.permute.xlu0 %599 }
 0x1fd   :  { %v688_v35 = vsel %vm686_vm2, %v683_v59, %v644_v52  ;;  %v675_v13 = vsel %vm671_vm14, %v670_v33, %v600_v21 }
 0x1fe   :  { %1012 = vmatmul.mubr.msk.f32.vlgmr.msra.gmra.mrb[0].mxu1 %vm704_vm4, %v688_v35 }
 0x200   :  { %v614_v7 = vpop.permute.xlu1 %613  ;;  %v616_v54 = vpop.permute.xlu0 %615 }
 0x201   :  { %v679_v60 = vsel %vm676_vm15, %v674_v8, %v614_v7  ;;  %v680_v17 = vsel %vm676_vm15, %v675_v13, %v616_v54 }
 0x204   :  { %v630_v61 = vpop.permute.xlu1 %629  ;;  %v632_v45 = vpop.permute.xlu0 %631 }
 0x205   :  { %v684_v38 = vsel %vm681_vm0, %v679_v60, %v630_v61  ;;  %v685_v40 = vsel %vm681_vm0, %v680_v17, %v632_v45 }
 0x208   :  { %v646_v47 = vpop.permute.xlu1 %645  ;;  %v648_v36 = vpop.permute.xlu0 %647 }
 0x209   :  { %v689_v16 = vsel %vm686_vm2, %v684_v38, %v646_v47  ;;  %v690_v19 = vsel %vm686_vm2, %v685_v40, %v648_v36 }
 0x20a   :  { %1014 = vmatprep.mubr.msk.f32.mxu1 %vm704_vm4, %v689_v16 }
 0x20b   :  { %1015 = vmatmul.mubr.msk.f32.gmra.mrb[2].mxu1 %vm704_vm4, %v690_v19 }
 0x219   :  { %v804_v10 = vpop.permute.xlu1 %803  ;;  %v808_v53 = vpop.permute.xlu0 %807 }
 0x21a   :  { %v823_v44 = vmul.f32 %v821_v48, %v808_v53 }
 0x21d   :  { %v812_v25 = vpop.permute.xlu1 %811  ;;  %v127_v39 = vpop.permute.xlu0 %126 }
 0x21e   :  { %v129_v1 = vadd.f32 %v127_v39, %v1315_v26  ;;  %v824_v21 = vmul.f32 %v821_v48, %v812_v25 }
 0x220   :  { %v870_v24 = vadd.f32 1.0, %v129_v1 }
 0x221   :  { %v816_v63 = vpop.permute.xlu1 %815 }
 0x222   :  { %v874_v37 = vrot.slane %v870_v24, %v1294_v31  ;;  %v922_v29 = vrot.slane %v870_v24, %v1297_v32  ;;  %v825_v34 = vmul.f32 %v821_v48, %v816_v63 }
 0x224   :  { %924 = vrot.lane.b32.xlu1 %v922_v29, %s1146_s30  ;;  %876 = vrot.lane.b32.xlu0 %v874_v37, %s1146_s30 }
 0x225   :  { %v136_v41 = vpop.permute.xlu1 %135 }
 0x226   :  { %v138_v43 = vadd.f32 %v136_v41, %v1315_v26  ;;  %v822_v26 = vmul.f32 %v821_v48, %v804_v10 }
 0x228   :  { %v884_v6 = vrot.slane %v138_v43, %v1294_v31  ;;  %v932_v30 = vrot.slane %v138_v43, %v1297_v32 }
 0x22a   :  { %934 = vrot.lane.b32.xlu1 %v932_v30, %s1147_s8  ;;  %886 = vrot.lane.b32.xlu0 %v884_v6, %s1147_s8 }
 0x2d1   :  { %v1013_v50 = vpop.f32.mrb[0].mxu1 }
 0x2d2   :  { %v789_v46 = vadd.f32 %v1013_v50, %v703_v3  ;;  %v783_v23 = vpop.f32.mrb[1].mxu1 }
 0x2d3   :  { %v784_v27 = vadd.f32 %v783_v23, %v703_v3 }
 0x2d4   :  { %v827_v31 = vadd.f32 %v823_v44, %v789_v46 }
 0x2d5   :  { %v826_v56 = vadd.f32 %v822_v26, %v784_v27 }
 0x2d6   :  { %vm831_vm1 = vcmp.ge.f32.partialorder %v827_v31, 0.0  ;;  %v835_v32 = vmul.f32 0.2, %v827_v31 }
 0x2d7   :  { %vm830_vm5 = vcmp.ge.f32.partialorder %v826_v56, 0.0  ;;  %v834_v4 = vmul.f32 0.2, %v826_v56 }
 0x2d8   :  { %v839_v20 = vsel %vm831_vm1, %v827_v31, %v835_v32 }
 0x2d9   :  { %v843_v42 = vsel %vm199_vm3, %v839_v20, 0.0  ;;  %v838_v11 = vsel %vm830_vm5, %v826_v56, %v834_v4 }
 0x2da   :  { %v842_v22 = vsel %vm199_vm3, %v838_v11, 0.0 }
 0x2db   :  { %v844_v18 = vadd.f32 %v843_v42, %v842_v22 }
 0x2dd   :  { %v845_v14 = vrot.slane %v844_v18, 4 }
 0x2de   :  { %v1016_v28 = vpop.f32.mrb[2].mxu1 }
 0x2df   :  { %v846_v0 = vadd.f32 %v845_v14, %v844_v18  ;;  %v799_v59 = vadd.f32 %v1016_v28, %v703_v3  ;;  %v793_v52 = vpop.f32.mrb[3].mxu1 }
 0x2e0   :  { %v794_v35 = vadd.f32 %v793_v52, %v703_v3  ;;  %v925_v52 = vpop.permute.xlu1 %924 }
 0x2e1   :  { %v847_v12 = vrot.slane %v846_v0, 2  ;;  %v829_v15 = vadd.f32 %v825_v34, %v799_v59 }
 0x2e2   :  { %v828_v62 = vadd.f32 %v824_v21, %v794_v35 }
 0x2e3   :  { %v848_v5 = vadd.f32 %v847_v12, %v846_v0  ;;  %vm833_vm6 = vcmp.ge.f32.partialorder %v829_v15, 0.0  ;;  %v837_v7 = vmul.f32 0.2, %v829_v15 }
 0x2e4   :  { %vm832_vm7 = vcmp.ge.f32.partialorder %v828_v62, 0.0  ;;  %v836_v54 = vmul.f32 0.2, %v828_v62 }
 0x2e5   :  { %v849_v55 = vrot.slane %v848_v5, 1  ;;  %v841_v57 = vsel %vm833_vm6, %v829_v15, %v837_v7 }
 0x2e6   :  { %v892_v51 = vsel %vm199_vm3, %v841_v57, 0.0  ;;  %v840_v9 = vsel %vm832_vm7, %v828_v62, %v836_v54  ;;  %v935_v62 = vpop.permute.xlu1 %934 }
 0x2e7   :  { %v850_v61 = vadd.f32 %v849_v55, %v848_v5  ;;  %v891_v45 = vsel %vm199_vm3, %v840_v9, 0.0 }
 0x2e8   :  { %v893_v49 = vadd.f32 %v892_v51, %v891_v45 }
 0x2e9   :  { %v851_v33 = vmul.f32 0.0625, %v850_v61 }
 0x2ea   :  { %v894_v8 = vrot.slane %v893_v49, 4 }
 0x2eb   :  { %v852_v13 = vsub.f32 %v838_v11, %v851_v33  ;;  %v853_v60 = vsub.f32 %v839_v20, %v851_v33  ;;  %v877_v20 = vpop.permute.xlu0 %876 }
 0x2ec   :  { %v895_v17 = vadd.f32 %v894_v8, %v893_v49 }
 0x2ed   :  { %v854_v38 = vmul.f32 %v852_v13, %v852_v13  ;;  %v855_v40 = vmul.f32 %v853_v60, %v853_v60 }
 0x2ee   :  { %v896_v47 = vrot.slane %v895_v17, 2 }
 0x2ef   :  { %v856_v36 = vsel %vm199_vm3, %v854_v38, 0.0  ;;  %v857_v16 = vsel %vm199_vm3, %v855_v40, 0.0  ;;  %v887_v28 = vpop.permute.xlu0 %886 }
 0x2f0   :  { %v858_v19 = vadd.f32 %v857_v16, %v856_v36  ;;  %v897_v10 = vadd.f32 %v896_v47, %v895_v17 }
 0x2f2   :  { %v859_v53 = vrot.slane %v858_v19, 4  ;;  %v898_v25 = vrot.slane %v897_v10, 1 }
 0x2f4   :  { %v860_v39 = vadd.f32 %v859_v53, %v858_v19  ;;  %v899_v1 = vadd.f32 %v898_v25, %v897_v10 }
 0x2f6   :  { %v861_v24 = vrot.slane %v860_v39, 2  ;;  %v900_v63 = vmul.f32 0.0625, %v899_v1 }
 0x2f8   :  { %v862_v37 = vadd.f32 %v861_v24, %v860_v39  ;;  %v901_v29 = vsub.f32 %v840_v9, %v900_v63  ;;  %v902_v41 = vsub.f32 %v841_v57, %v900_v63 }
 0x2fa   :  { %v863_v43 = vrot.slane %v862_v37, 1  ;;  %v903_v6 = vmul.f32 %v901_v29, %v901_v29  ;;  %v904_v30 = vmul.f32 %v902_v41, %v902_v41 }
 0x2fc   :  { %v864_v2 = vadd.f32 %v863_v43, %v862_v37  ;;  %v905_v58 = vsel %vm199_vm3, %v903_v6, 0.0  ;;  %v906_v3 = vsel %vm199_vm3, %v904_v30, 0.0 }
 0x2fd   :  { %v907_v48 = vadd.f32 %v906_v3, %v905_v58 }
 0x2fe   :  { %v865_v50 = vmul.f32 0.0625, %v864_v2 }
 0x2ff   :  { %v908_v44 = vrot.slane %v907_v48, 4 }
 0x300   :  { %v866_v46 = vadd.f32 1e-05, %v865_v50 }
 0x301   :  { %v909_v23 = vadd.f32 %v908_v44, %v907_v48 }
 0x302   :  { %1097 = vrsqrt.f32 %v866_v46 }
 0x303   :  { %v910_v26 = vrot.slane %v909_v23, 2 }
 0x305   :  { %v911_v27 = vadd.f32 %v910_v26, %v909_v23 }
 0x307   :  { %v912_v31 = vrot.slane %v911_v27, 1 }
 0x309   :  { %v913_v56 = vadd.f32 %v912_v31, %v911_v27 }
 0x30b   :  { %v914_v32 = vmul.f32 0.0625, %v913_v56 }
 0x30c   :  { %v1098_v4 = vpop.eup %1097 }
 0x30d   :  { %v868_v42 = vmul.f32 %v1098_v4, %v852_v13  ;;  %v869_v11 = vmul.f32 %v1098_v4, %v853_v60  ;;  %v915_v22 = vadd.f32 1e-05, %v914_v32 }
 0x30f   :  { %v879_v18 = vmul.f32 %v877_v20, %v868_v42  ;;  %v880_v14 = vmul.f32 %v877_v20, %v869_v11  ;;  %1099 = vrsqrt.f32 %v915_v22 }
 0x311   :  { %v889_v34 = vadd.f32 %v887_v28, %v879_v18  ;;  %v890_v0 = vadd.f32 %v887_v28, %v880_v14 }
 0x313   :  { %939 = vst.msk [vmem:[#allocation2] sm:$0xff] %vm199_vm3, %v889_v34  ;;  %940 = vst.msk [vmem:[#allocation2 + $0x8] sm:$0xff] %vm199_vm3, %v890_v0 }
 0x319   :  { %v1100_v59 = vpop.eup %1099 }
 0x31a   :  { %v917_v21 = vmul.f32 %v1100_v59, %v901_v29  ;;  %v918_v35 = vmul.f32 %v1100_v59, %v902_v41 }
 0x31c   :  { %v927_v12 = vmul.f32 %v925_v52, %v917_v21  ;;  %v928_v15 = vmul.f32 %v925_v52, %v918_v35 }
 0x31e   :  { %v937_v5 = vadd.f32 %v935_v62, %v927_v12  ;;  %v938_v7 = vadd.f32 %v935_v62, %v928_v15 }
 0x320   :  { %941 = vst.msk [vmem:[#allocation2 + $0x10] sm:$0xff] %vm199_vm3, %v937_v5  ;;  %942 = vst.msk [vmem:[#allocation2 + $0x18] sm:$0xff] %vm199_vm3, %v938_v7 }
 0x321   :  { %1112 = shalt.err (!%p1109_p4)
}
 0x322   :  { %s1113_s4 = scalar_lea.hbm %s1714_s7, 512 }
 0x323   :  { %p1114_p5 = scmp.ne.s32.totalorder %s1714_s7, %s1113_s4  ;;  %p1117_p6 = scmp.lt.u32.totalorder %s1113_s4, %s1714_s7 }
 0x325   :  { %p1119_p7 = pnand %p1117_p6, %p1114_p5 }
 0x327   :  { %1122 = shalt.err (!%p1119_p7)
}
 0x328   :  { %s1149_s17 = smov 128  }
 0x329   :  { %954 = dma.vmem_to_hbm [thread:$0]  %s949_s10, 512, %s1714_s7, [#allocation3], %s1149_s17, %s1149_s17, %s1129_s1  }
 0x32a   :  { %1123 = dma.done.wait [#allocation3], 512  }
 0x32b   :  { %1124 = vsyncadd [#allocation3], 4294966784 }
 0x32c   :  { %958 = vsyncpa [#allocation3], 1 }

</bundles_post_ra>
